<compile_context>
chip_gen: v6e
topology: v6e:2x2x1
jax: 0.10.0
libtpu: 0.0.40
codegen_flags: <defaults>
</compile_context>

<pallas_src>
import jax
import jax.numpy as jnp
from jax import lax
from jax.experimental import pallas as pl
from jax.experimental.pallas import tpu as pltpu


def _mlp_kernel(x_ref,
                w1_ref, b1_ref,
                w2_ref, b2_ref,
                w3_ref, b3_ref,
                w4_ref, b4_ref,
                o_ref):
    """Whole MLP on one batch tile.

    x_ref: [TILE_B, 8] batch-major block (as stored in HBM).
    o_ref: [1, TILE_B] lane-dense output tile (batch on the lane axis).

    All compute is strictly per-column (per-sample); partial edge tiles are
    therefore safe: out-of-range columns hold garbage but their writes are
    discarded by Pallas.
    """
    x = x_ref[...].astype(jnp.float32)                       # [T, 8]

    # Layer 1: contract the feature axis on-chip ([6,8] . [T,8]^T -> [6,T]).
    y = lax.dot_general(w1_ref[...], x, (((1,), (1,)), ((), ())),
                        preferred_element_type=jnp.float32) + b1_ref[...]
    y = jnp.maximum(y, 0.0)

    # Layer 2: [4,6] @ [6,T] + [4,1] -> ReLU
    y = jnp.dot(w2_ref[...], y, preferred_element_type=jnp.float32) + b2_ref[...]
    y = jnp.maximum(y, 0.0)

    # Layer 3: [2,4] @ [4,T] + [2,1] -> ReLU
    y = jnp.dot(w3_ref[...], y, preferred_element_type=jnp.float32) + b3_ref[...]
    y = jnp.maximum(y, 0.0)

    # Layer 4: [1,2] @ [2,T] + [1,1] -> Sigmoid
    y = jnp.dot(w4_ref[...], y, preferred_element_type=jnp.float32) + b4_ref[...]
    o_ref[...] = jax.nn.sigmoid(y).astype(o_ref.dtype)


def mlp_forward(x, params, *, max_tile_b=16384):
    """x: [B, 8] (f32). Returns [B, 1] f32.

    Weights: params["wN"] is [out, in] (PyTorch layout), params["bN"] is [out, 1].
    """
    B, F = x.shape
    assert F == 8, F

    w1, b1 = params["w1"], params["b1"]
    w2, b2 = params["w2"], params["b2"]
    w3, b3 = params["w3"], params["b3"]
    w4, b4 = params["w4"], params["b4"]

    # --- tile choice: multiple of 256 lanes, >=2 grid steps when B allows,
    #     capped so the (lane-padded) streamed block fits every generation's VMEM.
    assert max_tile_b % 256 == 0
    target = max(pl.cdiv(B, 2), 1)                     # aim for >=2 grid steps
    tile_b = min(max_tile_b, ((target + 255) // 256) * 256)
    tile_b = max(tile_b, 256)
    grid = (pl.cdiv(B, tile_b),)                       # partial edge tile is OK

    def _resident(a):
        # Tiny weight/bias: same full block every grid step -> stays in VMEM.
        return pl.BlockSpec(a.shape, lambda i: (0,) * a.ndim)

    param_bytes = sum(int(a.size) * a.dtype.itemsize
                      for a in (w1, b1, w2, b2, w3, b3, w4, b4))
    cost = pl.CostEstimate(
        flops=2 * (8 * 6 + 6 * 4 + 4 * 2 + 2 * 1) * B,   # 164 flops/row
        transcendentals=2 * B,                            # sigmoid (EUP)
        bytes_accessed=int(x.size) * x.dtype.itemsize + 4 * B + param_bytes,
    )

    out = pl.pallas_call(
        _mlp_kernel,
        out_shape=jax.ShapeDtypeStruct((1, B), jnp.float32),
        grid=grid,
        in_specs=[
            pl.BlockSpec((tile_b, 8), lambda i: (i, 0)),   # streamed batch tile
            _resident(w1), _resident(b1),
            _resident(w2), _resident(b2),
            _resident(w3), _resident(b3),
            _resident(w4), _resident(b4),
        ],
        out_specs=pl.BlockSpec((1, tile_b), lambda i: (0, i)),  # lane-dense out
        compiler_params=pltpu.CompilerParams(
            dimension_semantics=("parallel",),
            vmem_limit_bytes=48 * 1024 * 1024,
        ),
        cost_estimate=cost,
    )(x, w1, b1, w2, b2, w3, b3, w4, b4)

    # [1, B] -> [B, 1] is a free reshape (no slice copy, no transpose copy).
    return out.reshape(B, 1)


def init_params(key):
    """Mimic torch.nn.Linear init: U(-1/sqrt(fan_in), +1/sqrt(fan_in)).

    Stored as W:[out, in] (PyTorch layout), b:[out, 1]."""
    dims = [(8, 6), (6, 4), (4, 2), (2, 1)]
    params = {}
    for i, (fan_in, fan_out) in enumerate(dims, start=1):
        key, kw, kb = jax.random.split(key, 3)
        bound = 1.0 / jnp.sqrt(float(fan_in))
        params[f"w{i}"] = jax.random.uniform(
            kw, (fan_out, fan_in), jnp.float32, -bound, bound)
        params[f"b{i}"] = jax.random.uniform(
            kb, (fan_out, 1), jnp.float32, -bound, bound)
    return params


def reference_forward(x, params):
    """Pure-JAX reference (batch-major, like torch)."""
    y = jnp.maximum(x @ params["w1"].T + params["b1"].T, 0.0)
    y = jnp.maximum(y @ params["w2"].T + params["b2"].T, 0.0)
    y = jnp.maximum(y @ params["w3"].T + params["b3"].T, 0.0)
    y = jax.nn.sigmoid(y @ params["w4"].T + params["b4"].T)
    return y


if __name__ == "__main__":
    key = jax.random.PRNGKey(0)
    key, kx1, kx2 = jax.random.split(key, 3)
    params = init_params(key)

    # Small batch: single (fully partial) tile.
    B1 = 8
    x1 = jax.random.normal(kx1, (B1, 8), dtype=jnp.float32)
    out1 = jax.block_until_ready(mlp_forward(x1, params))
    ref1 = reference_forward(x1, params)
    assert out1.shape == (B1, 1), out1.shape
    assert jnp.allclose(out1, ref1, atol=1e-5, rtol=1e-5)

    # Non-multiple batch: exercises the multi-step grid + partial edge tile.
    B2 = 300
    x2 = jax.random.normal(kx2, (B2, 8), dtype=jnp.float32)
    out2 = jax.block_until_ready(mlp_forward(x2, params))
    ref2 = reference_forward(x2, params)
    assert out2.shape == (B2, 1), out2.shape
    assert jnp.allclose(out2, ref2, atol=1e-5, rtol=1e-5)

    print("KERNEL_OK")
</pallas_src>

<mosaic_0001>
module attributes {stable_mosaic.version = 11 : i64} {
  func.func @_mlp_kernel(%arg0: i32, %arg1: memref<256x8xf32, #tpu.memory_space<vmem>>, %arg2: memref<6x8xf32, #tpu.memory_space<vmem>>, %arg3: memref<6x1xf32, #tpu.memory_space<vmem>>, %arg4: memref<4x6xf32, #tpu.memory_space<vmem>>, %arg5: memref<4x1xf32, #tpu.memory_space<vmem>>, %arg6: memref<2x4xf32, #tpu.memory_space<vmem>>, %arg7: memref<2x1xf32, #tpu.memory_space<vmem>>, %arg8: memref<1x2xf32, #tpu.memory_space<vmem>>, %arg9: memref<1x1xf32, #tpu.memory_space<vmem>>, %arg10: memref<1x256xf32, #tpu.memory_space<vmem>>) attributes {dimension_semantics = [#tpu.dimension_semantics<parallel>], iteration_bounds = array<i64: 1>, scalar_prefetch = 0 : i64, scratch_operands = 0 : i64, tpu.core_type = #tpu.core_type<tc>, window_params = [{transform_indices = @transform_0, window_bounds = array<i64: 256, 8>}, {pipeline_mode = #tpu.pipeline_mode<synchronous>, transform_indices = @transform_1, window_bounds = array<i64: 6, 8>}, {pipeline_mode = #tpu.pipeline_mode<synchronous>, transform_indices = @transform_2, window_bounds = array<i64: 6, 1>}, {pipeline_mode = #tpu.pipeline_mode<synchronous>, transform_indices = @transform_3, window_bounds = array<i64: 4, 6>}, {pipeline_mode = #tpu.pipeline_mode<synchronous>, transform_indices = @transform_4, window_bounds = array<i64: 4, 1>}, {pipeline_mode = #tpu.pipeline_mode<synchronous>, transform_indices = @transform_5, window_bounds = array<i64: 2, 4>}, {pipeline_mode = #tpu.pipeline_mode<synchronous>, transform_indices = @transform_6, window_bounds = array<i64: 2, 1>}, {pipeline_mode = #tpu.pipeline_mode<synchronous>, transform_indices = @transform_7, window_bounds = array<i64: 1, 2>}, {pipeline_mode = #tpu.pipeline_mode<synchronous>, transform_indices = @transform_8, window_bounds = array<i64: 1, 1>}, {transform_indices = @transform_9, window_bounds = array<i64: 1, 256>}]} {
    %c0 = arith.constant 0 : index
    %c0_0 = arith.constant 0 : index
    %0 = vector.load %arg1[%c0, %c0_0] : memref<256x8xf32, #tpu.memory_space<vmem>>, vector<256x8xf32>
    %c0_1 = arith.constant 0 : index
    %c0_2 = arith.constant 0 : index
    %1 = vector.load %arg2[%c0_1, %c0_2] : memref<6x8xf32, #tpu.memory_space<vmem>>, vector<6x8xf32>
    %cst = arith.constant dense<0.000000e+00> : vector<6x256xf32>
    %2 = tpu.matmul %1, %0, %cst {dimension_numbers = #tpu.dot_dimension_numbers<[1], [1], [0], [0], [0, 0, 1, 0], [], []>} : vector<6x8xf32>, vector<256x8xf32>, vector<6x256xf32> -> vector<6x256xf32>
    %c0_3 = arith.constant 0 : index
    %c0_4 = arith.constant 0 : index
    %3 = vector.load %arg3[%c0_3, %c0_4] : memref<6x1xf32, #tpu.memory_space<vmem>>, vector<6x1xf32>
    %4 = vector.broadcast %3 : vector<6x1xf32> to vector<6x256xf32>
    %5 = arith.addf %2, %4 : vector<6x256xf32>
    %cst_5 = arith.constant 0.000000e+00 : f32
    %6 = vector.broadcast %cst_5 : f32 to vector<6x256xf32>
    %7 = arith.maximumf %5, %6 : vector<6x256xf32>
    %c0_6 = arith.constant 0 : index
    %c0_7 = arith.constant 0 : index
    %8 = vector.load %arg4[%c0_6, %c0_7] : memref<4x6xf32, #tpu.memory_space<vmem>>, vector<4x6xf32>
    %cst_8 = arith.constant dense<0.000000e+00> : vector<4x256xf32>
    %9 = tpu.matmul %8, %7, %cst_8 {dimension_numbers = #tpu.dot_dimension_numbers<[1], [0], [0], [1], [0, 0, 1, 1], [], []>} : vector<4x6xf32>, vector<6x256xf32>, vector<4x256xf32> -> vector<4x256xf32>
    %c0_9 = arith.constant 0 : index
    %c0_10 = arith.constant 0 : index
    %10 = vector.load %arg5[%c0_9, %c0_10] : memref<4x1xf32, #tpu.memory_space<vmem>>, vector<4x1xf32>
    %11 = vector.broadcast %10 : vector<4x1xf32> to vector<4x256xf32>
    %12 = arith.addf %9, %11 : vector<4x256xf32>
    %cst_11 = arith.constant 0.000000e+00 : f32
    %13 = vector.broadcast %cst_11 : f32 to vector<4x256xf32>
    %14 = arith.maximumf %12, %13 : vector<4x256xf32>
    %c0_12 = arith.constant 0 : index
    %c0_13 = arith.constant 0 : index
    %15 = vector.load %arg6[%c0_12, %c0_13] : memref<2x4xf32, #tpu.memory_space<vmem>>, vector<2x4xf32>
    %cst_14 = arith.constant dense<0.000000e+00> : vector<2x256xf32>
    %16 = tpu.matmul %15, %14, %cst_14 {dimension_numbers = #tpu.dot_dimension_numbers<[1], [0], [0], [1], [0, 0, 1, 1], [], []>} : vector<2x4xf32>, vector<4x256xf32>, vector<2x256xf32> -> vector<2x256xf32>
    %c0_15 = arith.constant 0 : index
    %c0_16 = arith.constant 0 : index
    %17 = vector.load %arg7[%c0_15, %c0_16] : memref<2x1xf32, #tpu.memory_space<vmem>>, vector<2x1xf32>
    %18 = vector.broadcast %17 : vector<2x1xf32> to vector<2x256xf32>
    %19 = arith.addf %16, %18 : vector<2x256xf32>
    %cst_17 = arith.constant 0.000000e+00 : f32
    %20 = vector.broadcast %cst_17 : f32 to vector<2x256xf32>
    %21 = arith.maximumf %19, %20 : vector<2x256xf32>
    %c0_18 = arith.constant 0 : index
    %c0_19 = arith.constant 0 : index
    %22 = vector.load %arg8[%c0_18, %c0_19] : memref<1x2xf32, #tpu.memory_space<vmem>>, vector<1x2xf32>
    %cst_20 = arith.constant dense<0.000000e+00> : vector<1x256xf32>
    %23 = tpu.matmul %22, %21, %cst_20 {dimension_numbers = #tpu.dot_dimension_numbers<[1], [0], [0], [1], [0, 0, 1, 1], [], []>} : vector<1x2xf32>, vector<2x256xf32>, vector<1x256xf32> -> vector<1x256xf32>
    %c0_21 = arith.constant 0 : index
    %c0_22 = arith.constant 0 : index
    %24 = vector.load %arg9[%c0_21, %c0_22] : memref<1x1xf32, #tpu.memory_space<vmem>>, vector<1x1xf32>
    %25 = vector.broadcast %24 : vector<1x1xf32> to vector<1x256xf32>
    %26 = arith.addf %23, %25 : vector<1x256xf32>
    %27 = arith.negf %26 : vector<1x256xf32>
    %28 = math.exp %27 : vector<1x256xf32>
    %cst_23 = arith.constant 1.000000e+00 : f32
    %29 = vector.broadcast %cst_23 : f32 to vector<1x256xf32>
    %30 = arith.addf %29, %28 : vector<1x256xf32>
    %31 = arith.divf %29, %30 : vector<1x256xf32>
    %c0_24 = arith.constant 0 : index
    %c0_25 = arith.constant 0 : index
    %32 = vector.load %arg10[%c0_24, %c0_25] : memref<1x256xf32, #tpu.memory_space<vmem>>, vector<1x256xf32>
    tpu.vector_store %arg10[%c0_24, %c0_25], %31 {strides = array<i32>} : memref<1x256xf32, #tpu.memory_space<vmem>>, vector<1x256xf32>,
    return
  }
  func.func @transform_0(%arg0: i32) -> (i32, i32) {
    %c0_i32 = arith.constant 0 : i32
    %c0_i32_0 = arith.constant 0 : i32
    return %arg0, %c0_i32 : i32, i32
  }
  func.func @transform_1(%arg0: i32) -> (i32, i32) {
    %c0_i32 = arith.constant 0 : i32
    %c0_i32_0 = arith.constant 0 : i32
    %c0_i32_1 = arith.constant 0 : i32
    return %c0_i32, %c0_i32_0 : i32, i32
  }
  func.func @transform_2(%arg0: i32) -> (i32, i32) {
    %c0_i32 = arith.constant 0 : i32
    %c0_i32_0 = arith.constant 0 : i32
    %c0_i32_1 = arith.constant 0 : i32
    return %c0_i32, %c0_i32_0 : i32, i32
  }
  func.func @transform_3(%arg0: i32) -> (i32, i32) {
    %c0_i32 = arith.constant 0 : i32
    %c0_i32_0 = arith.constant 0 : i32
    %c0_i32_1 = arith.constant 0 : i32
    return %c0_i32, %c0_i32_0 : i32, i32
  }
  func.func @transform_4(%arg0: i32) -> (i32, i32) {
    %c0_i32 = arith.constant 0 : i32
    %c0_i32_0 = arith.constant 0 : i32
    %c0_i32_1 = arith.constant 0 : i32
    return %c0_i32, %c0_i32_0 : i32, i32
  }
  func.func @transform_5(%arg0: i32) -> (i32, i32) {
    %c0_i32 = arith.constant 0 : i32
    %c0_i32_0 = arith.constant 0 : i32
    %c0_i32_1 = arith.constant 0 : i32
    return %c0_i32, %c0_i32_0 : i32, i32
  }
  func.func @transform_6(%arg0: i32) -> (i32, i32) {
    %c0_i32 = arith.constant 0 : i32
    %c0_i32_0 = arith.constant 0 : i32
    %c0_i32_1 = arith.constant 0 : i32
    return %c0_i32, %c0_i32_0 : i32, i32
  }
  func.func @transform_7(%arg0: i32) -> (i32, i32) {
    %c0_i32 = arith.constant 0 : i32
    %c0_i32_0 = arith.constant 0 : i32
    %c0_i32_1 = arith.constant 0 : i32
    return %c0_i32, %c0_i32_0 : i32, i32
  }
  func.func @transform_8(%arg0: i32) -> (i32, i32) {
    %c0_i32 = arith.constant 0 : i32
    %c0_i32_0 = arith.constant 0 : i32
    %c0_i32_1 = arith.constant 0 : i32
    return %c0_i32, %c0_i32_0 : i32, i32
  }
  func.func @transform_9(%arg0: i32) -> (i32, i32) {
    %c0_i32 = arith.constant 0 : i32
    %c0_i32_0 = arith.constant 0 : i32
    return %c0_i32, %arg0 : i32, i32
  }
}

</mosaic_0001>

<bundles_post_ra>
// kernel: tpu_custom_call.1
= control target key start
LH: loop header
LB: loop body
LE: loop exit
PB: predicated region body
PF: predicated region fallthrough
CT: control target
= control target key end

     0   :  { %s896_s0 = inlined_call_operand.vmem [shape: f32[8,8], index: 0, kind: input, shape index: {}]   ;;  %s897_s1 = inlined_call_operand.vmem [shape: f32[6,8], index: 1, kind: input, shape index: {}]   ;;  %s898_s2 = inlined_call_operand.vmem [shape: f32[6,1], index: 2, kind: input, shape index: {}]   ;;  %s899_s3 = inlined_call_operand.vmem [shape: f32[4,6], index: 3, kind: input, shape index: {}]   ;;  %s900_s4 = inlined_call_operand.vmem [shape: f32[4,1], index: 4, kind: input, shape index: {}]   ;;  %s901_s5 = inlined_call_operand.vmem [shape: f32[2,4], index: 5, kind: input, shape index: {}]   ;;  %s902_s6 = inlined_call_operand.vmem [shape: f32[2,1], index: 6, kind: input, shape index: {}]   ;;  %s903_s7 = inlined_call_operand.vmem [shape: f32[1,2], index: 7, kind: input, shape index: {}]   ;;  %s904_s8 = inlined_call_operand.<no memory space> [shape: f32[1,1], index: 8, kind: input, shape index: {}]   ;;  %s905_s9 = inlined_call_operand.hbm [shape: f32[1,8], index: 9, kind: output, shape index: {}]  }
   0x1   :  { %v14_v0 = vstv %s904_s8 }
   0x2   :  { %15 = vst [vmem:[#allocation2] sm:$0x1] %v14_v0 }
   0x3   :  { %16 = vsyncpa [#allocation4], 0  ;;  %v66_v1 = vld [vmem:[%s896_s0 + $0xf8] sm:$0xff]  ;;  %vm74_vm0 = vcmask 64512   ;;  %v65_v3 = vld [vmem:[%s896_s0 + $0xf0] sm:$0xff]  ;;  %v685_v4 = vmov 0   ;;  %v436_v0 = vlaneseq }
   0x4   :  { %v50_v2 = vld [vmem:[%s896_s0 + $0x78] sm:$0xff]  ;;  %615 = vmatprep.subr.msk.mxu0 %vm74_vm0, %v66_v1  ;;  %653 = vset.pattern.permute.xlu0 %v685_v4  ;;  %v49_v5 = vld [vmem:[%s896_s0 + $0x70] sm:$0xff]  ;;  %v64_v6 = vld [vmem:[%s896_s0 + $0xe8] sm:$0xff]  ;;  %v686_v37 = vmov 0.0   ;;  %vm258_vm1 = vcmask 1045504   ;;  %vm254_vm2 = vcmask 48128  }
   0x5   :  { %616 = vmatpush3.xpose.msk.msra.mxu0 %vm74_vm0, %v50_v2  ;;  %654 = vset.pattern.permute.xlu1 %v685_v4  ;;  %v48_v7 = vld [vmem:[%s896_s0 + $0x68] sm:$0xff]  ;;  %v63_v8 = vld [vmem:[%s896_s0 + $0xe0] sm:$0xff]  ;;  %v62_v12 = vld [vmem:[%s896_s0 + $0xd8] sm:$0xff]  ;;  %vm349_vm3 = vcmask 1043456   ;;  %vm345_vm4 = vcmask 31744   ;;  %vm444_vm5 = vcmask 1041408  }
   0x6   :  { %617 = vmatprep.subr.msk.mxu0 %vm74_vm0, %v65_v3  ;;  %v47_v9 = vld [vmem:[%s896_s0 + $0x60] sm:$0xff]  ;;  %v46_v14 = vld [vmem:[%s896_s0 + $0x58] sm:$0xff]  ;;  %v61_v15 = vld [vmem:[%s896_s0 + $0xd0] sm:$0xff]  ;;  %329 = vmatprep.mubr.f32.mxu1 %v686_v37  ;;  %vm440_vm6 = vcmask 15360   ;;  %v437_v1 = vshrl.u32 %v436_v0, 7  ;;  %vm554_vm7 = vcmp.lt.s32.totalorder %v436_v0, 256 }
   0x7   :  { %v67_v10 = vld [vmem:[%s897_s1] sm:$0x3f]  ;;  %v45_v16 = vld [vmem:[%s896_s0 + $0x50] sm:$0xff]  ;;  %v60_v17 = vld [vmem:[%s896_s0 + $0xc8] sm:$0xff] }
   0x8   :  { %v68_v11 = vld [vmem:[%s898_s2] sm:$0x3f]  ;;  %647 = vmatprep.mubr.msk.f32.mxu0 %vm74_vm0, %v67_v10  ;;  %v44_v18 = vld [vmem:[%s896_s0 + $0x48] sm:$0xff]  ;;  %v58_v21 = vld [vmem:[%s896_s0 + $0xb8] sm:$0xff]  ;;  %v438_v2 = vsub.s32 0, %v437_v1 }
   0x9   :  { %618 = vmatpush3.xpose.msk.msra.mxu0 %vm74_vm0, %v49_v5  ;;  %71 = vperm.xlu0 %653, %v68_v11   ;;  %v248_v13 = vld [vmem:[%s900_s4] sm:$0xf]  ;;  %v42_v22 = vld [vmem:[%s896_s0 + $0x38] sm:$0xff]  ;;  %v57_v23 = vld [vmem:[%s896_s0 + $0xb0] sm:$0xff] }
   0xa   :  { %619 = vmatprep.subr.msk.mxu0 %vm74_vm0, %v64_v6  ;;  %v59_v19 = vld [vmem:[%s896_s0 + $0xc0] sm:$0xff]  ;;  %v41_v24 = vld [vmem:[%s896_s0 + $0x30] sm:$0xff]  ;;  %v56_v25 = vld [vmem:[%s896_s0 + $0xa8] sm:$0xff] }
   0xb   :  { %v43_v20 = vld [vmem:[%s896_s0 + $0x40] sm:$0xff]  ;;  %v40_v26 = vld [vmem:[%s896_s0 + $0x28] sm:$0xff]  ;;  %v54_v29 = vld [vmem:[%s896_s0 + $0x98] sm:$0xff] }
   0xc   :  { %v55_v27 = vld [vmem:[%s896_s0 + $0xa0] sm:$0xff]  ;;  %v38_v30 = vld [vmem:[%s896_s0 + $0x18] sm:$0xff]  ;;  %v53_v31 = vld [vmem:[%s896_s0 + $0x90] sm:$0xff] }
   0xd   :  { %620 = vmatpush3.xpose.msk.msra.mxu0 %vm74_vm0, %v48_v7  ;;  %251 = vperm.xlu0 %653, %v248_v13   ;;  %v39_v28 = vld [vmem:[%s896_s0 + $0x20] sm:$0xff]  ;;  %v37_v32 = vld [vmem:[%s896_s0 + $0x10] sm:$0xff]  ;;  %v52_v33 = vld [vmem:[%s896_s0 + $0x88] sm:$0xff] }
   0xe   :  { %621 = vmatprep.subr.msk.mxu0 %vm74_vm0, %v63_v8  ;;  %v36_v34 = vld [vmem:[%s896_s0 + $0x8] sm:$0xff]  ;;  %v51_v35 = vld [vmem:[%s896_s0 + $0x80] sm:$0xff] }
   0xf   :  { %v35_v36 = vld [vmem:[%s896_s0] sm:$0xff] }
  0x10   :  { %v247_v45 = vld [vmem:[%s899_s3] sm:$0xf] }
  0x11   :  { %622 = vmatpush3.xpose.msk.msra.mxu0 %vm74_vm0, %v47_v9  ;;  %v339_v46 = vld [vmem:[%s902_s6] sm:$0x3] }
  0x12   :  { %623 = vmatprep.subr.msk.mxu0 %vm74_vm0, %v62_v12  ;;  %342 = vperm.xlu1 %654, %v339_v46   ;;  %v430_v47 = vld [vmem:[#allocation2] sm:$0x1] }
  0x13   :  { %v338_v55 = vld [vmem:[%s901_s5] sm:$0x3] }
  0x14   :  { %v429_v63 = vld [vmem:[%s903_s7] sm:$0x1] }
  0x15   :  { %624 = vmatpush3.xpose.msk.msra.mxu0 %vm74_vm0, %v46_v14 }
  0x16   :  { %625 = vmatprep.subr.msk.mxu0 %vm74_vm0, %v61_v15  ;;  %433 = vperm.xlu1 %654, %v430_v47   ;;  %v687_v15 = vmov 1966171168  }
  0x19   :  { %626 = vmatpush3.xpose.msk.msra.mxu0 %vm74_vm0, %v45_v16  ;;  %v538_v16 = vunpack.c.l.s4 %v687_v15 }
  0x1a   :  { %627 = vmatprep.subr.msk.mxu0 %vm74_vm0, %v60_v17 }
  0x1b   :  { %v539_v17 = vunpack.c.0.s8 %v538_v16 }
  0x1d   :  { %628 = vmatpush3.xpose.msk.msra.mxu0 %vm74_vm0, %v44_v18 }
  0x1e   :  { %629 = vmatprep.subr.msk.mxu0 %vm74_vm0, %v59_v19  ;;  %v542_v19 = vsub.s32 %v539_v17, %v437_v1 }
  0x21   :  { %630 = vmatpush3.xpose.msk.msra.mxu0 %vm74_vm0, %v43_v20 }
  0x22   :  { %631 = vmatprep.subr.msk.mxu0 %vm74_vm0, %v58_v21 }
  0x25   :  { %632 = vmatpush3.xpose.msk.msra.mxu0 %vm74_vm0, %v42_v22 }
  0x26   :  { %633 = vmatprep.subr.msk.mxu0 %vm74_vm0, %v57_v23 }
  0x29   :  { %634 = vmatpush3.xpose.msk.msra.mxu0 %vm74_vm0, %v41_v24 }
  0x2a   :  { %635 = vmatprep.subr.msk.mxu0 %vm74_vm0, %v56_v25 }
  0x2d   :  { %636 = vmatpush3.xpose.msk.msra.mxu0 %vm74_vm0, %v40_v26 }
  0x2e   :  { %637 = vmatprep.subr.msk.mxu0 %vm74_vm0, %v55_v27 }
  0x31   :  { %638 = vmatpush3.xpose.msk.msra.mxu0 %vm74_vm0, %v39_v28 }
  0x32   :  { %639 = vmatprep.subr.msk.mxu0 %vm74_vm0, %v54_v29 }
  0x35   :  { %640 = vmatpush3.xpose.msk.msra.mxu0 %vm74_vm0, %v38_v30 }
  0x36   :  { %641 = vmatprep.subr.msk.mxu0 %vm74_vm0, %v53_v31 }
  0x39   :  { %642 = vmatpush3.xpose.msk.msra.mxu0 %vm74_vm0, %v37_v32 }
  0x3a   :  { %643 = vmatprep.subr.msk.mxu0 %vm74_vm0, %v52_v33 }
  0x3d   :  { %644 = vmatpush3.xpose.msk.msra.mxu0 %vm74_vm0, %v36_v34 }
  0x3e   :  { %645 = vmatprep.subr.msk.mxu0 %vm74_vm0, %v51_v35 }
  0x41   :  { %646 = vmatpush3.xpose.msk.msra.mxu0 %vm74_vm0, %v35_v36 }
  0x44   :  { %648 = vmatmul.mubr.msk.f32.vlgmr.msra.gmra.mxu0 %vm74_vm0, %v67_v10 }
  0x84   :  { %v72_v39 = vpop.permute.xlu0 %71 }
  0x88   :  { %v252_v49 = vpop.permute.xlu0 %251 }
  0x8d   :  { %v343_v57 = vpop.permute.xlu1 %342 }
  0x91   :  { %v434_v3 = vpop.permute.xlu1 %433 }
  0x92   :  { %v439_v4 = vrot.slane %v434_v3, %v438_v2 }
 0x104   :  { %v240_v38 = vpop.f32.mrf.mxu0 }
 0x105   :  { %v241_v40 = vadd.f32 %v240_v38, %v72_v39 }
 0x106   :  { %v242_v41 = vpop.f32.mrf.mxu0 }
 0x107   :  { %v243_v42 = vadd.f32 %v242_v41, %v72_v39  ;;  %v245_v44 = vmax.f32 %v241_v40, 0.0 }
 0x109   :  { %v246_v43 = vmax.f32 %v243_v42, 0.0 }
 0x10b   :  { %604 = vmatprep.subr.msk.mxu1 %vm258_vm1, %v246_v43 }
 0x10c   :  { %605 = vmatpush1.msk.msra.mxu1 %vm258_vm1, %v245_v44 }
 0x10d   :  { %606 = vmatmul.mubr.msk.f32.vlgmr.msra.gmra.mxu1 %vm254_vm2, %v247_v45 }
 0x10e   :  { %420 = vmatprep.mubr.f32.mxu1 %v686_v37 }
 0x1cd   :  { %v331_v48 = vpop.f32.mrf.mxu1 }
 0x1ce   :  { %v332_v50 = vadd.f32 %v331_v48, %v252_v49 }
 0x1cf   :  { %v333_v51 = vpop.f32.mrf.mxu1 }
 0x1d0   :  { %v334_v52 = vadd.f32 %v333_v51, %v252_v49  ;;  %v336_v54 = vmax.f32 %v332_v50, 0.0 }
 0x1d2   :  { %v337_v53 = vmax.f32 %v334_v52, 0.0 }
 0x1d4   :  { %607 = vmatprep.subr.msk.mxu1 %vm349_vm3, %v337_v53 }
 0x1d5   :  { %608 = vmatpush1.msk.msra.mxu1 %vm349_vm3, %v336_v54 }
 0x1d6   :  { %609 = vmatmul.mubr.msk.f32.vlgmr.msra.gmra.mxu1 %vm345_vm4, %v338_v55 }
 0x1d7   :  { %515 = vmatprep.mubr.f32.mxu1 %v686_v37 }
 0x296   :  { %v422_v56 = vpop.f32.mrf.mxu1 }
 0x297   :  { %v423_v58 = vadd.f32 %v422_v56, %v343_v57 }
 0x298   :  { %v424_v59 = vpop.f32.mrf.mxu1 }
 0x299   :  { %v425_v60 = vadd.f32 %v424_v59, %v343_v57  ;;  %v427_v62 = vmax.f32 %v423_v58, 0.0 }
 0x29b   :  { %v428_v61 = vmax.f32 %v425_v60, 0.0 }
 0x29d   :  { %610 = vmatprep.subr.msk.mxu1 %vm444_vm5, %v428_v61 }
 0x29e   :  { %611 = vmatpush1.msk.msra.mxu1 %vm444_vm5, %v427_v62 }
 0x29f   :  { %612 = vmatmul.mubr.msk.f32.vlgmr.msra.gmra.mxu1 %vm440_vm6, %v429_v63 }
 0x35f   :  { %v517_v5 = vpop.f32.mrf.mxu1 }
 0x360   :  { %v518_v6 = vadd.f32 %v517_v5, %v439_v4 }
 0x361   :  { %v519_v7 = vpop.f32.mrf.mxu1 }
 0x362   :  { %v613_v8 = vmul.f32 -1.442695, %v518_v6  ;;  %v520_v9 = vadd.f32 %v519_v7, %v439_v4 }
 0x364   :  { %655 = vpow2.f32 %v613_v8  ;;  %v614_v10 = vmul.f32 -1.442695, %v520_v9 }
 0x366   :  { %657 = vpow2.f32 %v614_v10 }
 0x371   :  { %v656_v11 = vpop.eup %655 }
 0x372   :  { %v528_v12 = vadd.f32 1.0, %v656_v11 }
 0x373   :  { %v658_v13 = vpop.eup %657 }
 0x374   :  { %v529_v14 = vadd.f32 1.0, %v658_v13  ;;  %659 = vrcp.f32 %v528_v12 }
 0x376   :  { %661 = vrcp.f32 %v529_v14 }
 0x381   :  { %v660_v18 = vpop.eup %659 }
 0x383   :  { %v662_v20 = vpop.eup %661 }
 0x384   :  { %v536_v21 = vcombine.low %v660_v18, %v662_v20 }
 0x386   :  { %v543_v22 = vrot.slane %v536_v21, %v542_v19 }
 0x388   :  { %v550_v23 = vrot.slane %v543_v22, %v542_v19 }
 0x38a   :  { %556 = vst.msk [vmem:[#allocation3] sm:$0x3] %vm554_vm7, %v550_v23 }
 0x38b   :  { %561 = vsyncadd [#allocation4], 16  ;;  %s688_s5 = smov [#allocation3]  }
 0x38c   :  { %s563_s7 = sshll.u32 %s688_s5, 4  ;;  %s564_s7 = int_to_ptr.vmem [resolvable:$true] %s563_s7 }
 0x38d   :  { %s663_s13 = scalar_lea.vmem %s564_s7, 16  ;;  %s667_s2 = scalar_lea.vmem %s564_s7, 32 }
 0x38e   :  { %p664_p0 = scmp.ne.s32.totalorder %s564_s7, %s663_s13  ;;  %p668_p1 = scmp.lt.s32.totalorder %s564_s7, %s564_s7 }
 0x38f   :  { %p669_p2 = scmp.lt.s32.totalorder %s667_s2, %s663_s13 }
 0x391   :  { %p670_p3 = por %p669_p2, %p668_p1 }
 0x393   :  { %p671_p4 = pnand %p670_p3, %p664_p0 }
 0x395   :  { %674 = shalt.err (!%p671_p4)
}
 0x396   :  { %566 = dma.vmem_to_hbm [thread:$0]  %s564_s7, 16, %s905_s9, [#allocation4]  }
 0x397   :  { %683 = dma.done.wait [#allocation4], 32  }
 0x398   :  { %684 = vsyncadd [#allocation4], 4294967264 }
 0x399   :  { %570 = vsyncpa [#allocation4], 1 }

</bundles_post_ra>
